<compile_context>
chip_gen: v6e
topology: v6e:2x2x1
jax: 0.10.0
libtpu: 0.0.40
codegen_flags: <defaults>
</compile_context>

<pallas_src>
import functools
import math

import jax
import jax.numpy as jnp
from jax.experimental import pallas as pl
from jax.experimental.pallas import tpu as pltpu


def _round_up(x, m):
    return (x + m - 1) // m * m


def _gelu_exact(x):
    # nn.GELU() default = exact erf formulation (erf runs on the EUP).
    return 0.5 * x * (1.0 + jax.lax.erf(x * (1.0 / math.sqrt(2.0))))


def _device_vmem_capacity():
    """Physical VMEM bytes of the attached TPU; conservative fallback."""
    try:
        info = pltpu.get_tpu_info()
        cap = getattr(info, "vmem_capacity_bytes", None)
        if cap:
            return int(cap)
    except Exception:
        pass
    return 64 * 1024 * 1024  # v7x-sized fallback (safe on every generation)


def ff_kernel(x_ref, w1t_ref, b1_ref, w2t_ref, b2_ref, o_ref, *scratch, nk):
    # grid = (nm, nk)
    # x_ref:   (tm, dim_p)        token tile (input dtype; cast in-kernel)
    # w1t_ref: (dim_p, tk)        slab of first linear, (in, out) layout
    # b1_ref:  (1, tk)            f32 bias slab of first linear
    # w2t_ref: (tk, dim_out_p)    slab of second linear, (in, out) layout
    # b2_ref:  (1, dim_out_p)     f32 bias of second linear
    # o_ref:   (tm, dim_out_p)    output tile
    # scratch: (acc_ref,) f32 accumulator, only allocated when nk > 1
    cdt = w1t_ref.dtype
    h = jnp.dot(x_ref[...].astype(cdt), w1t_ref[...],
                preferred_element_type=jnp.float32)
    h = _gelu_exact(h + b1_ref[...])
    # Dropout(p=0.0) is the identity -> no-op.
    partial = jnp.dot(h.astype(cdt), w2t_ref[...],
                      preferred_element_type=jnp.float32)

    if nk == 1:
        # Weight-stationary path: no accumulator round-trip at all.
        o_ref[...] = (partial + b2_ref[...]).astype(o_ref.dtype)
    else:
        acc_ref = scratch[0]
        k = pl.program_id(1)

        @pl.when(k == 0)
        def _():
            acc_ref[...] = partial

        @pl.when(jnp.logical_and(k > 0, k < nk - 1))
        def _():
            acc_ref[...] += partial

        @pl.when(k == nk - 1)
        def _():
            # Fold this step's partial directly into the output (no extra
            # acc store+load on the final step).
            o_ref[...] = (acc_ref[...] + partial + b2_ref[...]).astype(o_ref.dtype)


def prepare_params(w1, b1, w2, b2, *, compute_dtype=jnp.bfloat16):
    """Pad to lane-dense (multiple-of-128) feature dims, transpose to (in, out)
    layout and cast the weights ONCE, outside the per-call hot path.
    PyTorch layout in: w1 (inner, dim), b1 (inner,), w2 (dim_out, inner), b2 (dim_out,)."""
    inner_dim, dim = w1.shape
    dim_out = w2.shape[0]
    dim_p = _round_up(dim, 128)
    inner_p = _round_up(inner_dim, 128)
    dim_out_p = _round_up(dim_out, 128)

    w1t = jnp.zeros((dim_p, inner_p), compute_dtype)
    w1t = w1t.at[:dim, :inner_dim].set(w1.T.astype(compute_dtype))
    w2t = jnp.zeros((inner_p, dim_out_p), compute_dtype)
    w2t = w2t.at[:inner_dim, :dim_out].set(w2.T.astype(compute_dtype))
    # Biases stay f32 (added to f32 accumulations).
    b1p = jnp.zeros((1, inner_p), jnp.float32).at[0, :inner_dim].set(
        b1.astype(jnp.float32))
    b2p = jnp.zeros((1, dim_out_p), jnp.float32).at[0, :dim_out].set(
        b2.astype(jnp.float32))

    return dict(w1t=w1t, b1=b1p, w2t=w2t, b2=b2p,
                dim=dim, inner_dim=inner_dim, dim_out=dim_out,
                compute_dtype=compute_dtype)


def feed_forward(x, params, *, tm=512, tk=None):
    """x: (batch, seq, dim). Matches PyTorch:
    Linear(dim, inner) -> GELU -> Dropout(0.0) -> Linear(inner, dim_out)."""
    B, S, dim = x.shape
    assert dim == params["dim"]
    dim_out = params["dim_out"]
    compute_dtype = params["compute_dtype"]
    out_dtype = x.dtype
    w1t, b1p, w2t, b2p = params["w1t"], params["b1"], params["w2t"], params["b2"]
    dim_p, inner_p = w1t.shape
    dim_out_p = w2t.shape[1]

    x_itemsize = jnp.dtype(x.dtype).itemsize
    w_itemsize = jnp.dtype(compute_dtype).itemsize
    out_itemsize = jnp.dtype(out_dtype).itemsize

    # --- VMEM budget (generation-aware) ------------------------------------
    vmem_cap = _device_vmem_capacity()           # 64 MiB v7x, 128 MiB v5e/v6e
    budget = int(0.80 * vmem_cap)                # headroom for compiler scratch

    def _vmem_bytes(tm_, tk_):
        # Double-buffered inputs/outputs + f32 accumulator + h headroom.
        return (2 * tm_ * dim_p * x_itemsize          # x tiles
                + 2 * dim_p * tk_ * w_itemsize        # w1t slabs
                + 2 * tk_ * 4                         # b1 slabs (f32)
                + 2 * tk_ * dim_out_p * w_itemsize    # w2t slabs
                + 2 * dim_out_p * 4                   # b2 (f32)
                + 2 * tm_ * dim_out_p * out_itemsize  # out tiles
                + tm_ * dim_out_p * 4                 # acc scratch (worst case)
                + tm_ * tk_ * 4)                      # h intermediate

    # --- token-tile sizing ---------------------------------------------------
    M = B * S
    sub = 16 if compute_dtype == jnp.bfloat16 else 8   # sublane packing
    tm = max(sub, min(tm, _round_up(M, sub)))
    tm = _round_up(tm, sub)
    # Shrink tm until the minimum-tk working set fits the VMEM budget.
    while tm > sub and _vmem_bytes(tm, 128) > budget:
        tm = max(sub, _round_up(tm // 2, sub))
    # Give both TensorCores work on the "parallel" m axis (v7x megacore):
    if _round_up(M, tm) // tm < 2 and M > sub:
        tm = max(sub, _round_up(pl.cdiv(M, 2), sub))
    M_p = _round_up(M, tm)
    nm = M_p // tm

    # --- inner-dim tile sizing: prefer weight-stationary (nk == 1) ----------
    if tk is None:
        tk = inner_p
    tk = max(128, min(_round_up(tk, 128), inner_p))
    if _vmem_bytes(tm, inner_p) <= budget:
        tk = inner_p                # weights DMA'd from HBM exactly once
    else:
        while tk > 128 and (inner_p % tk != 0 or _vmem_bytes(tm, tk) > budget):
            tk -= 128
        tk = max(tk, 128)           # 128 always divides inner_p
    nk = inner_p // tk
    # TODO(synk): if profiling shows exposed weight DMA when nk > 1, add
    # pipeline_mode=pl.Buffered(3) on the w1t/w2t BlockSpecs (VMEM permitting).

    # --- activations: pad only if needed, cast happens inside the kernel ----
    x2d = x.reshape(M, dim)
    if dim != dim_p or M != M_p:
        x_in = jnp.zeros((M_p, dim_p), x2d.dtype).at[:M, :dim].set(x2d)
    else:
        x_in = x2d

    # --- VMEM limit & cost estimate ------------------------------------------
    vmem_needed = _vmem_bytes(tm, tk)
    vmem_limit = min(max(int(vmem_needed * 1.3) + (4 << 20), 16 << 20),
                     int(0.95 * vmem_cap))

    weight_bytes = (dim_p * inner_p + inner_p * dim_out_p) * w_itemsize
    weight_traffic = weight_bytes if nk == 1 else nm * weight_bytes
    cost = pl.CostEstimate(
        flops=2 * M_p * (dim_p * inner_p + inner_p * dim_out_p),
        transcendentals=M_p * inner_p,
        bytes_accessed=(M_p * dim_p * x_itemsize
                        + weight_traffic
                        + M_p * dim_out_p * out_itemsize),
    )

    scratch_shapes = ([pltpu.VMEM((tm, dim_out_p), jnp.float32)] if nk > 1 else [])
    kernel = functools.partial(ff_kernel, nk=nk)

    out_p = pl.pallas_call(
        kernel,
        out_shape=jax.ShapeDtypeStruct((M_p, dim_out_p), out_dtype),
        grid_spec=pltpu.PrefetchScalarGridSpec(
            num_scalar_prefetch=0,
            grid=(nm, nk),
            in_specs=[
                pl.BlockSpec((tm, dim_p), lambda i, k: (i, 0)),
                pl.BlockSpec((dim_p, tk), lambda i, k: (0, k)),
                pl.BlockSpec((1, tk), lambda i, k: (0, k)),
                pl.BlockSpec((tk, dim_out_p), lambda i, k: (k, 0)),
                pl.BlockSpec((1, dim_out_p), lambda i, k: (0, 0)),
            ],
            out_specs=pl.BlockSpec((tm, dim_out_p), lambda i, k: (i, 0)),
            scratch_shapes=scratch_shapes,
        ),
        compiler_params=pltpu.CompilerParams(
            dimension_semantics=("parallel", "arbitrary"),
            vmem_limit_bytes=vmem_limit),
        cost_estimate=cost,
    )(x_in, w1t, b1p, w2t, b2p)

    return out_p[:M, :dim_out].reshape(B, S, dim_out)


if __name__ == "__main__":
    # Module hyper-params (inner_dim == dim per the reference __init__)
    dim = 32
    inner_dim = dim
    dim_out = 32
    batch, seq = 2, 8

    key = jax.random.PRNGKey(0)
    kx, k1, k2, k3, k4 = jax.random.split(key, 5)

    x = jax.random.normal(kx, (batch, seq, dim), dtype=jnp.float32)

    # Deterministic parameter init (PyTorch Linear layout: weight (out, in), bias (out,))
    bound1 = 1.0 / math.sqrt(dim)
    w1 = jax.random.uniform(k1, (inner_dim, dim), minval=-bound1, maxval=bound1,
                            dtype=jnp.float32)
    b1 = jax.random.uniform(k2, (inner_dim,), minval=-bound1, maxval=bound1,
                            dtype=jnp.float32)
    bound2 = 1.0 / math.sqrt(inner_dim)
    w2 = jax.random.uniform(k3, (dim_out, inner_dim), minval=-bound2, maxval=bound2,
                            dtype=jnp.float32)
    b2 = jax.random.uniform(k4, (dim_out,), minval=-bound2, maxval=bound2,
                            dtype=jnp.float32)

    # Plain-JAX reference (f32)
    ref = x.reshape(-1, dim) @ w1.T + b1
    ref = 0.5 * ref * (1.0 + jax.lax.erf(ref / math.sqrt(2.0)))
    ref = (ref @ w2.T + b2).reshape(batch, seq, dim_out)

    # --- default bf16 MXU-input path (f32 accumulation) ----------------------
    params_bf16 = prepare_params(w1, b1, w2, b2)           # bf16 default
    out_bf16 = jax.block_until_ready(feed_forward(x, params_bf16))
    assert out_bf16.shape == ref.shape
    assert jnp.allclose(out_bf16, ref, atol=5e-2, rtol=5e-2), "bf16 mismatch vs reference"

    # --- f32 path (tight tolerance) ------------------------------------------
    params_f32 = prepare_params(w1, b1, w2, b2, compute_dtype=jnp.float32)
    out_f32 = jax.block_until_ready(feed_forward(x, params_f32))
    assert jnp.allclose(out_f32, ref, atol=1e-4, rtol=1e-4), "f32 mismatch vs reference"

    print("KERNEL_OK")
</pallas_src>

<mosaic_0001>
module attributes {stable_mosaic.version = 11 : i64} {
  func.func @ff_kernel(%arg0: i32, %arg1: i32, %arg2: memref<16x128xf32, #tpu.memory_space<vmem>>, %arg3: memref<128x128xbf16, #tpu.memory_space<vmem>>, %arg4: memref<1x128xf32, #tpu.memory_space<vmem>>, %arg5: memref<128x128xbf16, #tpu.memory_space<vmem>>, %arg6: memref<1x128xf32, #tpu.memory_space<vmem>>, %arg7: memref<16x128xf32, #tpu.memory_space<vmem>>) attributes {dimension_semantics = [#tpu.dimension_semantics<parallel>, #tpu.dimension_semantics<arbitrary>], iteration_bounds = array<i64: 1, 1>, scalar_prefetch = 0 : i64, scratch_operands = 0 : i64, tpu.core_type = #tpu.core_type<tc>, window_params = [{transform_indices = @transform_0, window_bounds = array<i64: 16, 128>}, {transform_indices = @transform_1, window_bounds = array<i64: 128, 128>}, {transform_indices = @transform_2, window_bounds = array<i64: 1, 128>}, {transform_indices = @transform_3, window_bounds = array<i64: 128, 128>}, {pipeline_mode = #tpu.pipeline_mode<synchronous>, transform_indices = @transform_4, window_bounds = array<i64: 1, 128>}, {transform_indices = @transform_5, window_bounds = array<i64: 16, 128>}]} {
    %c0 = arith.constant 0 : index
    %c0_0 = arith.constant 0 : index
    %0 = vector.load %arg2[%c0, %c0_0] : memref<16x128xf32, #tpu.memory_space<vmem>>, vector<16x128xf32>
    %1 = arith.truncf %0 : vector<16x128xf32> to vector<16x128xbf16>
    %c0_1 = arith.constant 0 : index
    %c0_2 = arith.constant 0 : index
    %2 = vector.load %arg3[%c0_1, %c0_2] : memref<128x128xbf16, #tpu.memory_space<vmem>>, vector<128x128xbf16>
    %cst = arith.constant dense<0.000000e+00> : vector<16x128xf32>
    %3 = tpu.matmul %1, %2, %cst {dimension_numbers = #tpu.dot_dimension_numbers<[1], [0], [0], [1], [0, 0, 1, 1], [], []>} : vector<16x128xbf16>, vector<128x128xbf16>, vector<16x128xf32> -> vector<16x128xf32>
    %c0_3 = arith.constant 0 : index
    %c0_4 = arith.constant 0 : index
    %4 = vector.load %arg4[%c0_3, %c0_4] : memref<1x128xf32, #tpu.memory_space<vmem>>, vector<1x128xf32>
    %5 = vector.broadcast %4 : vector<1x128xf32> to vector<16x128xf32>
    %6 = arith.addf %3, %5 : vector<16x128xf32>
    %cst_5 = arith.constant 5.000000e-01 : f32
    %7 = vector.broadcast %cst_5 : f32 to vector<16x128xf32>
    %8 = arith.mulf %7, %6 : vector<16x128xf32>
    %cst_6 = arith.constant 0.707106769 : f32
    %9 = vector.broadcast %cst_6 : f32 to vector<16x128xf32>
    %10 = arith.mulf %6, %9 : vector<16x128xf32>
    %11 = math.erf %10 : vector<16x128xf32>
    %cst_7 = arith.constant 1.000000e+00 : f32
    %12 = vector.broadcast %cst_7 : f32 to vector<16x128xf32>
    %13 = arith.addf %12, %11 : vector<16x128xf32>
    %14 = arith.mulf %8, %13 : vector<16x128xf32>
    %15 = arith.truncf %14 : vector<16x128xf32> to vector<16x128xbf16>
    %c0_8 = arith.constant 0 : index
    %c0_9 = arith.constant 0 : index
    %16 = vector.load %arg5[%c0_8, %c0_9] : memref<128x128xbf16, #tpu.memory_space<vmem>>, vector<128x128xbf16>
    %cst_10 = arith.constant dense<0.000000e+00> : vector<16x128xf32>
    %17 = tpu.matmul %15, %16, %cst_10 {dimension_numbers = #tpu.dot_dimension_numbers<[1], [0], [0], [1], [0, 0, 1, 1], [], []>} : vector<16x128xbf16>, vector<128x128xbf16>, vector<16x128xf32> -> vector<16x128xf32>
    %c0_11 = arith.constant 0 : index
    %c0_12 = arith.constant 0 : index
    %18 = vector.load %arg6[%c0_11, %c0_12] : memref<1x128xf32, #tpu.memory_space<vmem>>, vector<1x128xf32>
    %19 = vector.broadcast %18 : vector<1x128xf32> to vector<16x128xf32>
    %20 = arith.addf %17, %19 : vector<16x128xf32>
    %c0_13 = arith.constant 0 : index
    %c0_14 = arith.constant 0 : index
    %21 = vector.load %arg7[%c0_13, %c0_14] : memref<16x128xf32, #tpu.memory_space<vmem>>, vector<16x128xf32>
    tpu.vector_store %arg7[%c0_13, %c0_14], %20 {strides = array<i32>} : memref<16x128xf32, #tpu.memory_space<vmem>>, vector<16x128xf32>,
    return
  }
  func.func @transform_0(%arg0: i32, %arg1: i32) -> (i32, i32) {
    %c0_i32 = arith.constant 0 : i32
    %c0_i32_0 = arith.constant 0 : i32
    return %arg0, %c0_i32 : i32, i32
  }
  func.func @transform_1(%arg0: i32, %arg1: i32) -> (i32, i32) {
    %c0_i32 = arith.constant 0 : i32
    %c0_i32_0 = arith.constant 0 : i32
    return %c0_i32, %arg1 : i32, i32
  }
  func.func @transform_2(%arg0: i32, %arg1: i32) -> (i32, i32) {
    %c0_i32 = arith.constant 0 : i32
    %c0_i32_0 = arith.constant 0 : i32
    return %c0_i32, %arg1 : i32, i32
  }
  func.func @transform_3(%arg0: i32, %arg1: i32) -> (i32, i32) {
    %c0_i32 = arith.constant 0 : i32
    %c0_i32_0 = arith.constant 0 : i32
    return %arg1, %c0_i32 : i32, i32
  }
  func.func @transform_4(%arg0: i32, %arg1: i32) -> (i32, i32) {
    %c0_i32 = arith.constant 0 : i32
    %c0_i32_0 = arith.constant 0 : i32
    %c0_i32_1 = arith.constant 0 : i32
    return %c0_i32, %c0_i32_0 : i32, i32
  }
  func.func @transform_5(%arg0: i32, %arg1: i32) -> (i32, i32) {
    %c0_i32 = arith.constant 0 : i32
    %c0_i32_0 = arith.constant 0 : i32
    return %arg0, %c0_i32 : i32, i32
  }
}

</mosaic_0001>

<bundles_post_ra>
// kernel: tpu_custom_call.1
= control target key start
LH: loop header
LB: loop body
LE: loop exit
PB: predicated region body
PF: predicated region fallthrough
CT: control target
= control target key end

     0   :  { %10 = vsyncpa [#allocation3], 0  ;;  %s577_s0 = inlined_call_operand.hbm [shape: f32[16,128], index: 0, kind: input, shape index: {}]   ;;  %s578_s1 = inlined_call_operand.hbm [shape: bf16[128,128], index: 1, kind: input, shape index: {}]   ;;  %s579_s2 = inlined_call_operand.vmem [shape: f32[1,128], index: 2, kind: input, shape index: {}]   ;;  %s580_s3 = inlined_call_operand.hbm [shape: bf16[128,128], index: 3, kind: input, shape index: {}]   ;;  %s581_s4 = inlined_call_operand.vmem [shape: f32[1,128], index: 4, kind: input, shape index: {}]   ;;  %s582_s5 = inlined_call_operand.hbm [shape: f32[16,128], index: 5, kind: output, shape index: {}]  }
   0x1   :  { %11 = vsyncpa [#allocation6], 0 }
   0x2   :  { %12 = vsyncpa [#allocation4], 0  ;;  %s513_s18 = smov [#allocation5]  }
   0x3   :  { %s30_s19 = sshll.u32 %s513_s18, 4  ;;  %s31_s19 = int_to_ptr.vmem [resolvable:$true] %s30_s19 }
   0x4   :  { %s435_s20 = scalar_lea.vmem %s31_s19, 1024  ;;  %p440_p1 = scmp.lt.s32.totalorder %s31_s19, %s31_s19 }
   0x5   :  { %p436_p0 = scmp.ne.s32.totalorder %s31_s19, %s435_s20  ;;  %p441_p2 = scmp.lt.s32.totalorder %s435_s20, %s435_s20 }
   0x7   :  { %p442_p3 = por %p441_p2, %p440_p1 }
   0x9   :  { %p443_p4 = pnand %p442_p3, %p436_p0 }
   0xb   :  { %446 = shalt.err (!%p443_p4)
}
   0xc   :  { %s514_s21 = smov 64   ;;  %s515_s22 = smov 4  }
   0xd   :  { %36 = dma.hbm_to_vmem [thread:$0]  %s578_s1, 1024, %s31_s19, [#allocation6], %s514_s21, %s514_s21, %s515_s22  }
   0xe   :  { %s516_s25 = smov [#allocation2]  }
   0xf   :  { %s18_s26 = sshll.u32 %s516_s25, 4  ;;  %s19_s26 = int_to_ptr.vmem [resolvable:$true] %s18_s26 }
  0x10   :  { %s455_s27 = scalar_lea.vmem %s19_s26, 256  ;;  %p460_p6 = scmp.lt.s32.totalorder %s19_s26, %s19_s26 }
  0x11   :  { %p456_p5 = scmp.ne.s32.totalorder %s19_s26, %s455_s27  ;;  %p461_p7 = scmp.lt.s32.totalorder %s455_s27, %s455_s27 }
  0x13   :  { %p462_p8 = por %p461_p7, %p460_p6 }
  0x15   :  { %p463_p9 = pnand %p462_p8, %p456_p5 }
  0x17   :  { %466 = shalt.err (!%p463_p9)
}
  0x18   :  { %s517_s28 = smov 128   ;;  %s518_s29 = smov 8  }
  0x19   :  { %24 = dma.hbm_to_vmem [thread:$0]  %s577_s0, 256, %s19_s26, [#allocation3], %s517_s28, %s517_s28, %s518_s29  }
  0x1a   :  { %s519_s1 = smov [#allocation7]  }
  0x1b   :  { %s44_s7 = sshll.u32 %s519_s1, 4  ;;  %s45_s7 = int_to_ptr.vmem [resolvable:$true] %s44_s7 }
  0x1c   :  { %s475_s8 = scalar_lea.vmem %s45_s7, 1024  ;;  %p480_p11 = scmp.lt.s32.totalorder %s45_s7, %s45_s7 }
  0x1d   :  { %p476_p10 = scmp.ne.s32.totalorder %s45_s7, %s475_s8  ;;  %p481_p12 = scmp.lt.s32.totalorder %s475_s8, %s475_s8 }
  0x1f   :  { %p482_p13 = por %p481_p12, %p480_p11 }
  0x21   :  { %p483_p0 = pnand %p482_p13, %p476_p10 }
  0x23   :  { %486 = shalt.err (!%p483_p0)
}
  0x24   :  { %50 = dma.hbm_to_vmem [thread:$0]  %s580_s3, 1024, %s45_s7, [#allocation6], %s514_s21, %s514_s21, %s515_s22  }
  0x25   :  { %507 = dma.done.wait [#allocation3], 256  }
  0x26   :  { %508 = vsyncadd [#allocation3], 4294967040 }
  0x27   :  { %509 = dma.done.wait [#allocation6], 2048  }
  0x28   :  { %510 = vsyncadd [#allocation6], 4294965248  ;;  %v520_v0 = vmov 0.0   ;;  %vm521_vm0 = vmmov 0   ;;  %v407_v1 = vld [vmem:[#allocation5 + $0x38] sm:$0xff]   ;;  %v408_v2 = vld [vmem:[#allocation5 + $0x30] sm:$0xff]  }
  0x29   :  { %357 = vmatprep.subr.bf16.mxu0 %v520_v0  ;;  %373 = vmatprep.mubr.msk.bf16.mxu0 %vm521_vm0, %v520_v0  ;;  %v409_v3 = vld [vmem:[#allocation5 + $0x28] sm:$0xff]   ;;  %v410_v4 = vld [vmem:[#allocation5 + $0x20] sm:$0xff]   ;;  %v415_v5 = vld [vmem:[#allocation7 + $0x38] sm:$0xff]   ;;  %s522_s12 = smov [#allocation8]  }
  0x2a   :  { %377 = vmatprep.subr.bf16.mxu1 %v520_v0  ;;  %393 = vmatprep.mubr.msk.bf16.mxu1 %vm521_vm0, %v520_v0  ;;  %v411_v6 = vld [vmem:[#allocation5 + $0x18] sm:$0xff]   ;;  %v412_v7 = vld [vmem:[#allocation5 + $0x10] sm:$0xff]   ;;  %v413_v8 = vld [vmem:[#allocation5 + $0x8] sm:$0xff]   ;;  %s308_s13 = sshll.u32 %s522_s12, 4  ;;  %s309_s13 = int_to_ptr.vmem [resolvable:$true] %s308_s13 }
  0x2b   :  { %358 = vmatpush3.bf16.msra.mxu0 %v407_v1  ;;  %378 = vmatpush3.bf16.msra.mxu1 %v415_v5  ;;  %v414_v9 = vld [vmem:[#allocation5] sm:$0xff]   ;;  %v63_v10 = vld [vmem:[#allocation2] sm:$0xff]  ;;  %v64_v11 = vld [vmem:[#allocation2 + $0x8] sm:$0xff]  ;;  %s487_s14 = scalar_lea.vmem %s309_s13, 256  ;;  %p492_p2 = scmp.lt.s32.totalorder %s309_s13, %s309_s13 }
  0x2c   :  { %359 = vmatprep.subr.bf16.mxu0 %v520_v0  ;;  %379 = vmatprep.subr.bf16.mxu1 %v520_v0  ;;  %v65_v12 = vpack.c.bf16 %v64_v11, %v63_v10  ;;  %v416_v13 = vld [vmem:[#allocation7 + $0x30] sm:$0xff]   ;;  %v417_v14 = vld [vmem:[#allocation7 + $0x28] sm:$0xff]   ;;  %v418_v15 = vld [vmem:[#allocation7 + $0x20] sm:$0xff]   ;;  %p488_p1 = scmp.ne.s32.totalorder %s309_s13, %s487_s14  ;;  %p493_p3 = scmp.lt.s32.totalorder %s487_s14, %s487_s14 }
  0x2d   :  { %v419_v16 = vld [vmem:[#allocation7 + $0x18] sm:$0xff]   ;;  %v420_v17 = vld [vmem:[#allocation7 + $0x10] sm:$0xff]   ;;  %v421_v18 = vld [vmem:[#allocation7 + $0x8] sm:$0xff]  }
  0x2e   :  { %v422_v19 = vld [vmem:[#allocation7] sm:$0xff]   ;;  %v321_v20 = vld [vmem:[%s579_s2] ss:$0 sm:$0xff]  ;;  %p494_p4 = por %p493_p3, %p492_p2 }
  0x2f   :  { %360 = vmatpush3.bf16.msra.mxu0 %v408_v2  ;;  %380 = vmatpush3.bf16.msra.mxu1 %v416_v13  ;;  %v330_v38 = vld [vmem:[%s581_s4] ss:$0 sm:$0xff] }
  0x30   :  { %361 = vmatprep.subr.bf16.mxu0 %v520_v0  ;;  %381 = vmatprep.subr.bf16.mxu1 %v520_v0  ;;  %p495_p5 = pnand %p494_p4, %p488_p1 }
  0x33   :  { %362 = vmatpush3.bf16.msra.mxu0 %v409_v3  ;;  %382 = vmatpush3.bf16.msra.mxu1 %v417_v14 }
  0x34   :  { %363 = vmatprep.subr.bf16.mxu0 %v520_v0  ;;  %383 = vmatprep.subr.bf16.mxu1 %v520_v0 }
  0x37   :  { %364 = vmatpush3.bf16.msra.mxu0 %v410_v4  ;;  %384 = vmatpush3.bf16.msra.mxu1 %v418_v15 }
  0x38   :  { %365 = vmatprep.subr.bf16.mxu0 %v520_v0  ;;  %385 = vmatprep.subr.bf16.mxu1 %v520_v0 }
  0x3b   :  { %366 = vmatpush3.bf16.msra.mxu0 %v411_v6  ;;  %386 = vmatpush3.bf16.msra.mxu1 %v419_v16 }
  0x3c   :  { %367 = vmatprep.subr.bf16.mxu0 %v520_v0  ;;  %387 = vmatprep.subr.bf16.mxu1 %v520_v0 }
  0x3f   :  { %368 = vmatpush3.bf16.msra.mxu0 %v412_v7  ;;  %388 = vmatpush3.bf16.msra.mxu1 %v420_v17 }
  0x40   :  { %369 = vmatprep.subr.bf16.mxu0 %v520_v0  ;;  %389 = vmatprep.subr.bf16.mxu1 %v520_v0 }
  0x43   :  { %370 = vmatpush3.bf16.msra.mxu0 %v413_v8  ;;  %390 = vmatpush3.bf16.msra.mxu1 %v421_v18 }
  0x44   :  { %371 = vmatprep.subr.bf16.mxu0 %v520_v0  ;;  %391 = vmatprep.subr.bf16.mxu1 %v520_v0 }
  0x47   :  { %372 = vmatpush3.bf16.msra.mxu0 %v414_v9  ;;  %392 = vmatpush3.bf16.msra.mxu1 %v422_v19 }
  0x4a   :  { %374 = vmatmul.mubr.bf16.vlgmr.msra.gmra.mxu0 %v65_v12 }
 0x10a   :  { %v171_v21 = vpop.f32.mrf.mxu0 }
 0x10b   :  { %v172_v22 = vadd.f32 %v321_v20, %v171_v21 }
 0x10c   :  { %v375_v23 = vpop.f32.mrf.mxu0 }
 0x10d   :  { %v180_v24 = vmul.f32 0.70710677, %v172_v22  ;;  %v178_v32 = vmul.f32 0.5, %v172_v22 }
 0x10e   :  { %v174_v25 = vpop.f32.mrf.mxu0 }
 0x10f   :  { %423 = verf.f32 %v180_v24  ;;  %v175_v26 = vadd.f32 %v321_v20, %v174_v25 }
 0x110   :  { %v376_v27 = vpop.f32.mrf.mxu0 }
 0x111   :  { %v181_v28 = vmul.f32 0.70710677, %v175_v26  ;;  %v179_v33 = vmul.f32 0.5, %v175_v26 }
 0x113   :  { %425 = verf.f32 %v181_v28 }
 0x11c   :  { %v424_v29 = vpop.eup %423 }
 0x11d   :  { %v184_v30 = vadd.f32 1.0, %v424_v29 }
 0x11f   :  { %v186_v35 = vmul.f32 %v184_v30, %v178_v32 }
 0x120   :  { %v426_v31 = vpop.eup %425 }
 0x121   :  { %v185_v34 = vadd.f32 1.0, %v426_v31 }
 0x123   :  { %v187_v36 = vmul.f32 %v185_v34, %v179_v33 }
 0x125   :  { %v188_v37 = vpack.c.bf16 %v187_v36, %v186_v35 }
 0x127   :  { %394 = vmatmul.mubr.bf16.vlgmr.msra.gmra.mxu1 %v188_v37 }
 0x1e7   :  { %v294_v39 = vpop.f32.mrf.mxu1 }
 0x1e8   :  { %v295_v40 = vadd.f32 %v330_v38, %v294_v39 }
 0x1e9   :  { %v395_v41 = vpop.f32.mrf.mxu1 }
 0x1ea   :  { %301 = vst [vmem:[#allocation8] sm:$0xff] %v295_v40 }
 0x1eb   :  { %v297_v42 = vpop.f32.mrf.mxu1 }
 0x1ec   :  { %v298_v43 = vadd.f32 %v330_v38, %v297_v42 }
 0x1ed   :  { %v396_v44 = vpop.f32.mrf.mxu1 }
 0x1ee   :  { %302 = vst [vmem:[#allocation8 + $0x8] sm:$0xff] %v298_v43 }
 0x1ef   :  { %498 = shalt.err (!%p495_p5)
}
 0x1f0   :  { %314 = dma.vmem_to_hbm [thread:$0]  %s309_s13, 256, %s582_s5, [#allocation4], %s517_s28, %s517_s28, %s518_s29  }
 0x1f1   :  { %511 = dma.done.wait [#allocation4], 256  }
 0x1f2   :  { %512 = vsyncadd [#allocation4], 4294967040 }
 0x1f3   :  { %318 = vsyncpa [#allocation3], 1 }
 0x1f4   :  { %319 = vsyncpa [#allocation6], 1 }
 0x1f5   :  { %320 = vsyncpa [#allocation4], 1 }

</bundles_post_ra>
